<compile_context>
chip_gen: v7x
topology: tpu7x:2x2x1
jax: 0.10.0
libtpu: 0.0.40
codegen_flags: <defaults>
</compile_context>

<pallas_src>
import functools

import jax
import jax.numpy as jnp
from jax.experimental import pallas as pl
from jax.experimental.pallas import tpu as pltpu

# TODO(synk): tokenizer + AutoModel (BERT) backbone are external pretrained
# components; they are replaced here by a synthetic CLS-embedding input.

HEAD_PAD = 128  # lane-dense padding for the packed (3 + 10)-wide heads


def _encoder_kernel(x_ref, w1_ref, b1_ref, wf_ref, bf_ref, out_ref):
    """Fused financial_adapter + heads.

    x_ref : [tile_b, H]  f32
    w1_ref: [H, D]       bf16
    b1_ref: [1, D]       f32
    wf_ref: [D, D+128]   bf16   ( [w2 | w2 @ Wh] )
    bf_ref: [1, D+128]   f32    ( [b2 | b2 @ Wh + bh] )
    out   : [tile_b, D+128] f32 (cols [0:D]=embeddings, [D:D+128]=packed heads)
    """
    x = x_ref[...].astype(jnp.bfloat16)
    # financial_adapter[0]: Linear(H -> D) + ReLU   (Dropout = identity, eval)
    h = jnp.dot(x, w1_ref[...], preferred_element_type=jnp.float32) + b1_ref[...]
    h = jnp.maximum(h, 0.0)
    # financial_adapter[3] + sentiment_head + topic_head fused into one matmul
    out = jnp.dot(h.astype(jnp.bfloat16), wf_ref[...],
                  preferred_element_type=jnp.float32) + bf_ref[...]
    out_ref[...] = out.astype(out_ref.dtype)


def init_params(key, hidden_size, d_model, seq_len):
    """Deterministic synthetic parameters (shapes from the module __init__)."""
    ks = jax.random.split(key, 8)
    scale = 0.02
    return {
        # financial_adapter: Linear(hidden_size, d_model), Linear(d_model, d_model)
        "w1": scale * jax.random.normal(ks[0], (hidden_size, d_model), jnp.float32),
        "b1": scale * jax.random.normal(ks[1], (1, d_model), jnp.float32),
        "w2": scale * jax.random.normal(ks[2], (d_model, d_model), jnp.float32),
        "b2": scale * jax.random.normal(ks[3], (1, d_model), jnp.float32),
        # sentiment_head: Linear(d_model, 3); topic_head: Linear(d_model, 10)
        "w_sent": scale * jax.random.normal(ks[4], (d_model, 3), jnp.float32),
        "b_sent": scale * jax.random.normal(ks[5], (1, 3), jnp.float32),
        "w_topic": scale * jax.random.normal(ks[6], (d_model, 10), jnp.float32),
        "b_topic": scale * jax.random.normal(ks[7], (1, 10), jnp.float32),
        "seq_len": seq_len,
    }


def prepare_params(params):
    """One-time parameter prep (run once, NOT per forward call).

    Packs sentiment/topic heads into a lane-padded [D, 128] matrix, fuses the
    second adapter Linear with the heads (w2 @ Wh), concatenates into a single
    [D, D+128] fused weight, and casts matmul operands to bf16.
    """
    D = params["w2"].shape[1]
    wh = jnp.zeros((D, HEAD_PAD), jnp.float32)
    wh = wh.at[:, 0:3].set(params["w_sent"]).at[:, 3:13].set(params["w_topic"])
    bh = jnp.zeros((1, HEAD_PAD), jnp.float32)
    bh = bh.at[:, 0:3].set(params["b_sent"]).at[:, 3:13].set(params["b_topic"])

    w2h = params["w2"] @ wh                       # [D, 128]
    bhp = params["b2"] @ wh + bh                  # [1, 128]
    w_fused = jnp.concatenate([params["w2"], w2h], axis=1)   # [D, D+128]
    b_fused = jnp.concatenate([params["b2"], bhp], axis=1)   # [1, D+128]

    return {
        "w1": params["w1"].astype(jnp.bfloat16),
        "b1": params["b1"].astype(jnp.float32),
        "w_fused": w_fused.astype(jnp.bfloat16),
        "b_fused": b_fused.astype(jnp.float32),
        "d_model": D,
        "hidden_size": params["w1"].shape[0],
        "seq_len": params["seq_len"],
    }


@functools.partial(jax.jit, static_argnames=("batch_tile",))
def _encoder_call(cls_embeddings, w1, b1, w_fused, b_fused, *, batch_tile):
    B, H = cls_embeddings.shape
    D = w1.shape[1]
    n_out = D + HEAD_PAD

    # Batch tiling: single block for small B; otherwise a parallel grid over
    # batch tiles (weights stay VMEM-resident via index_map -> (0, 0)).
    # NOTE: B must be a multiple of 8 (f32 sublane tile) when gridded.
    if B <= batch_tile or B % batch_tile != 0:
        tile_b = B
    else:
        tile_b = batch_tile
    grid = (B // tile_b,)

    cost = pl.CostEstimate(
        flops=2 * B * H * D + 2 * B * D * n_out,
        transcendentals=0,
        bytes_accessed=(cls_embeddings.size * 4 + w1.size * 2 + b1.size * 4
                        + w_fused.size * 2 + b_fused.size * 4 + B * n_out * 4),
    )

    out = pl.pallas_call(
        _encoder_kernel,
        out_shape=jax.ShapeDtypeStruct((B, n_out), jnp.float32),
        grid_spec=pltpu.PrefetchScalarGridSpec(
            num_scalar_prefetch=0,
            grid=grid,
            in_specs=[
                pl.BlockSpec((tile_b, H), lambda i: (i, 0)),     # activations
                pl.BlockSpec((H, D), lambda i: (0, 0)),          # w1 (resident)
                pl.BlockSpec((1, D), lambda i: (0, 0)),          # b1
                pl.BlockSpec((D, n_out), lambda i: (0, 0)),      # fused weight
                pl.BlockSpec((1, n_out), lambda i: (0, 0)),      # fused bias
            ],
            out_specs=pl.BlockSpec((tile_b, n_out), lambda i: (i, 0)),
        ),
        compiler_params=pltpu.CompilerParams(
            dimension_semantics=("parallel",)),
        cost_estimate=cost,
    )(cls_embeddings, w1, b1, w_fused, b_fused)
    return out


def financial_text_encoder(cls_embeddings, prep, *, batch_tile=256):
    """cls_embeddings: [B, H] float32 (BERT CLS vectors), prep: prepare_params().

    Returns dict matching the PyTorch forward(): embeddings [B, D],
    sentiments [B, 3], topics [B, 10], attention_mask [B, S] (all-ones
    placeholder since tokenization is not reproduced here).
    """
    B = cls_embeddings.shape[0]
    D = prep["d_model"]
    out = _encoder_call(cls_embeddings, prep["w1"], prep["b1"],
                        prep["w_fused"], prep["b_fused"], batch_tile=batch_tile)
    return {
        "embeddings": out[:, :D],
        "sentiments": out[:, D:D + 3],
        "topics": out[:, D + 3:D + 13],
        "attention_mask": jnp.ones((B, prep["seq_len"]), jnp.int32),
    }


def _reference_f32(cls_emb, params):
    """Pure-f32, un-fused reference (matches the PyTorch module math)."""
    h = jnp.maximum(cls_emb @ params["w1"] + params["b1"], 0.0)
    emb = h @ params["w2"] + params["b2"]
    sent = emb @ params["w_sent"] + params["b_sent"]
    top = emb @ params["w_topic"] + params["b_topic"]
    return emb, sent, top


def _reference_matched(cls_emb, prep):
    """Reference using the same bf16/fused math as the kernel."""
    x = cls_emb.astype(jnp.bfloat16)
    h = jnp.maximum(jnp.dot(x, prep["w1"], preferred_element_type=jnp.float32)
                    + prep["b1"], 0.0)
    out = jnp.dot(h.astype(jnp.bfloat16), prep["w_fused"],
                  preferred_element_type=jnp.float32) + prep["b_fused"]
    D = prep["d_model"]
    return out[:, :D], out[:, D:D + 3], out[:, D + 3:D + 13]


if __name__ == "__main__":
    key = jax.random.PRNGKey(0)
    k_in, k_par = jax.random.split(key)

    B = 8            # number of texts in the batch
    HIDDEN = 128     # synthetic BERT hidden size (real BERT: 768)
    D_MODEL = 128    # config.d_model
    SEQ = 16         # synthetic tokenized sequence length

    cls_embeddings = jax.random.normal(k_in, (B, HIDDEN), jnp.float32)
    params = init_params(k_par, HIDDEN, D_MODEL, SEQ)
    prep = jax.tree_util.tree_map(
        lambda x: x, prepare_params(params))          # one-time param prep

    out = financial_text_encoder(cls_embeddings, prep)
    jax.block_until_ready(out)

    # shape checks
    assert out["embeddings"].shape == (B, D_MODEL)
    assert out["sentiments"].shape == (B, 3)
    assert out["topics"].shape == (B, 10)
    assert out["attention_mask"].shape == (B, SEQ)

    # tight check vs. a pure-JAX reference that uses the same bf16/fused math
    emb_m, sent_m, top_m = _reference_matched(cls_embeddings, prep)
    assert jnp.allclose(out["embeddings"], emb_m, atol=1e-4, rtol=1e-3)
    assert jnp.allclose(out["sentiments"], sent_m, atol=1e-4, rtol=1e-3)
    assert jnp.allclose(out["topics"], top_m, atol=1e-4, rtol=1e-3)

    # loose semantic check vs. the full-precision un-fused (PyTorch-style) math
    emb_r, sent_r, top_r = _reference_f32(cls_embeddings, params)
    assert jnp.allclose(out["embeddings"], emb_r, atol=3e-3)
    assert jnp.allclose(out["sentiments"], sent_r, atol=3e-3)
    assert jnp.allclose(out["topics"], top_r, atol=3e-3)

    print("KERNEL_OK")
</pallas_src>

<mosaic_0001>
module attributes {stable_mosaic.version = 11 : i64} {
  func.func @_encoder_kernel(%arg0: i32, %arg1: memref<8x128xf32, #tpu.memory_space<vmem>>, %arg2: memref<128x128xbf16, #tpu.memory_space<vmem>>, %arg3: memref<1x128xf32, #tpu.memory_space<vmem>>, %arg4: memref<128x256xbf16, #tpu.memory_space<vmem>>, %arg5: memref<1x256xf32, #tpu.memory_space<vmem>>, %arg6: memref<8x256xf32, #tpu.memory_space<vmem>>) attributes {dimension_semantics = [#tpu.dimension_semantics<parallel>], iteration_bounds = array<i64: 1>, scalar_prefetch = 0 : i64, scratch_operands = 0 : i64, tpu.core_type = #tpu.core_type<tc>, window_params = [{transform_indices = @transform_0, window_bounds = array<i64: 8, 128>}, {pipeline_mode = #tpu.pipeline_mode<synchronous>, transform_indices = @transform_1, window_bounds = array<i64: 128, 128>}, {pipeline_mode = #tpu.pipeline_mode<synchronous>, transform_indices = @transform_2, window_bounds = array<i64: 1, 128>}, {pipeline_mode = #tpu.pipeline_mode<synchronous>, transform_indices = @transform_3, window_bounds = array<i64: 128, 256>}, {pipeline_mode = #tpu.pipeline_mode<synchronous>, transform_indices = @transform_4, window_bounds = array<i64: 1, 256>}, {transform_indices = @transform_5, window_bounds = array<i64: 8, 256>}]} {
    %c0 = arith.constant 0 : index
    %c0_0 = arith.constant 0 : index
    %0 = vector.load %arg1[%c0, %c0_0] : memref<8x128xf32, #tpu.memory_space<vmem>>, vector<8x128xf32>
    %1 = arith.truncf %0 : vector<8x128xf32> to vector<8x128xbf16>
    %c0_1 = arith.constant 0 : index
    %c0_2 = arith.constant 0 : index
    %2 = vector.load %arg2[%c0_1, %c0_2] : memref<128x128xbf16, #tpu.memory_space<vmem>>, vector<128x128xbf16>
    %cst = arith.constant dense<0.000000e+00> : vector<8x128xf32>
    %3 = tpu.matmul %1, %2, %cst {dimension_numbers = #tpu.dot_dimension_numbers<[1], [0], [0], [1], [0, 0, 1, 1], [], []>} : vector<8x128xbf16>, vector<128x128xbf16>, vector<8x128xf32> -> vector<8x128xf32>
    %c0_3 = arith.constant 0 : index
    %c0_4 = arith.constant 0 : index
    %4 = vector.load %arg3[%c0_3, %c0_4] : memref<1x128xf32, #tpu.memory_space<vmem>>, vector<1x128xf32>
    %5 = vector.broadcast %4 : vector<1x128xf32> to vector<8x128xf32>
    %6 = arith.addf %3, %5 : vector<8x128xf32>
    %cst_5 = arith.constant 0.000000e+00 : f32
    %7 = vector.broadcast %cst_5 : f32 to vector<8x128xf32>
    %8 = arith.maximumf %6, %7 : vector<8x128xf32>
    %9 = arith.truncf %8 : vector<8x128xf32> to vector<8x128xbf16>
    %c0_6 = arith.constant 0 : index
    %c0_7 = arith.constant 0 : index
    %10 = vector.load %arg4[%c0_6, %c0_7] : memref<128x256xbf16, #tpu.memory_space<vmem>>, vector<128x256xbf16>
    %cst_8 = arith.constant dense<0.000000e+00> : vector<8x256xf32>
    %11 = tpu.matmul %9, %10, %cst_8 {dimension_numbers = #tpu.dot_dimension_numbers<[1], [0], [0], [1], [0, 0, 1, 1], [], []>} : vector<8x128xbf16>, vector<128x256xbf16>, vector<8x256xf32> -> vector<8x256xf32>
    %c0_9 = arith.constant 0 : index
    %c0_10 = arith.constant 0 : index
    %12 = vector.load %arg5[%c0_9, %c0_10] : memref<1x256xf32, #tpu.memory_space<vmem>>, vector<1x256xf32>
    %13 = vector.broadcast %12 : vector<1x256xf32> to vector<8x256xf32>
    %14 = arith.addf %11, %13 : vector<8x256xf32>
    %c0_11 = arith.constant 0 : index
    %c0_12 = arith.constant 0 : index
    %15 = vector.load %arg6[%c0_11, %c0_12] : memref<8x256xf32, #tpu.memory_space<vmem>>, vector<8x256xf32>
    tpu.vector_store %arg6[%c0_11, %c0_12], %14 {strides = array<i32>} : memref<8x256xf32, #tpu.memory_space<vmem>>, vector<8x256xf32>,
    return
  }
  func.func @transform_0(%arg0: i32) -> (i32, i32) {
    %c0_i32 = arith.constant 0 : i32
    %c0_i32_0 = arith.constant 0 : i32
    return %arg0, %c0_i32 : i32, i32
  }
  func.func @transform_1(%arg0: i32) -> (i32, i32) {
    %c0_i32 = arith.constant 0 : i32
    %c0_i32_0 = arith.constant 0 : i32
    %c0_i32_1 = arith.constant 0 : i32
    return %c0_i32, %c0_i32_0 : i32, i32
  }
  func.func @transform_2(%arg0: i32) -> (i32, i32) {
    %c0_i32 = arith.constant 0 : i32
    %c0_i32_0 = arith.constant 0 : i32
    %c0_i32_1 = arith.constant 0 : i32
    return %c0_i32, %c0_i32_0 : i32, i32
  }
  func.func @transform_3(%arg0: i32) -> (i32, i32) {
    %c0_i32 = arith.constant 0 : i32
    %c0_i32_0 = arith.constant 0 : i32
    %c0_i32_1 = arith.constant 0 : i32
    return %c0_i32, %c0_i32_0 : i32, i32
  }
  func.func @transform_4(%arg0: i32) -> (i32, i32) {
    %c0_i32 = arith.constant 0 : i32
    %c0_i32_0 = arith.constant 0 : i32
    %c0_i32_1 = arith.constant 0 : i32
    return %c0_i32, %c0_i32_0 : i32, i32
  }
  func.func @transform_5(%arg0: i32) -> (i32, i32) {
    %c0_i32 = arith.constant 0 : i32
    %c0_i32_0 = arith.constant 0 : i32
    return %arg0, %c0_i32 : i32, i32
  }
}

</mosaic_0001>

<bundles_post_ra>
// kernel: _encoder_call.1
= control target key start
LH: loop header
LB: loop body
LE: loop exit
PB: predicated region body
PF: predicated region fallthrough
CT: control target
= control target key end

     0   :  { %10 = vsyncpa [#allocation3], 0  ;;  %s629_s0 = inlined_call_operand.hbm [shape: f32[8,128], index: 0, kind: input, shape index: {}]   ;;  %s630_s1 = inlined_call_operand.hbm [shape: bf16[128,128], index: 1, kind: input, shape index: {}]   ;;  %s631_s2 = inlined_call_operand.vmem [shape: f32[1,128], index: 2, kind: input, shape index: {}]   ;;  %s632_s3 = inlined_call_operand.hbm [shape: bf16[128,256], index: 3, kind: input, shape index: {}]   ;;  %s633_s4 = inlined_call_operand.vmem [shape: f32[1,256], index: 4, kind: input, shape index: {}]   ;;  %s634_s5 = inlined_call_operand.hbm [shape: f32[8,256], index: 5, kind: output, shape index: {}]  }
   0x1   :  { %11 = vsyncpa [#allocation6], 0 }
   0x2   :  { %12 = vsyncpa [#allocation4], 0  ;;  %s534_s18 = smov [#allocation5]   ;;  %s440_s22 = scalar_lea.hbm %s630_s1, 1024 }
   0x3   :  { %s28_s19 = sshll.u32 %s534_s18, 4  ;;  %p441_p0 = scmp.ne.s32.totalorder %s630_s1, %s440_s22  ;;  %s29_s19 = int_to_ptr.vmem [resolvable:$true] %s28_s19 }
   0x4   :  { %p444_p1 = scmp.lt.u32.totalorder %s440_s22, %s630_s1 }
   0x6   :  { %p446_p2 = pnand %p444_p1, %p441_p0 }
   0x8   :  { %449 = shalt.err (!%p446_p2)
}
   0x9   :  { %s450_s27 = scalar_lea.vmem %s29_s19, 1024  ;;  %p455_p4 = scmp.lt.s32.totalorder %s29_s19, %s29_s19 }
   0xa   :  { %p451_p3 = scmp.ne.s32.totalorder %s29_s19, %s450_s27  ;;  %p456_p5 = scmp.lt.s32.totalorder %s450_s27, %s450_s27 }
   0xc   :  { %p457_p6 = por %p456_p5, %p455_p4 }
   0xe   :  { %p458_p7 = pnand %p457_p6, %p451_p3 }
  0x10   :  { %461 = shalt.err (!%p458_p7)
}
  0x11   :  { %s535_s28 = smov 64   ;;  %s536_s29 = smov 4  }
  0x12   :  { %34 = dma.hbm_to_vmem [thread:$0]  %s630_s1, 1024, %s29_s19, [#allocation6], %s535_s28, %s535_s28, %s536_s29  }
  0x13   :  { %s537_s7 = smov [#allocation2]   ;;  %s538_s9 = smov [#allocation7]  }
  0x14   :  { %s19_s8 = sshll.u32 %s537_s7, 4  ;;  %s42_s10 = sshll.u32 %s538_s9, 4  ;;  %s20_s8 = int_to_ptr.vmem [resolvable:$true] %s19_s8  ;;  %s43_s10 = int_to_ptr.vmem [resolvable:$true] %s42_s10 }
  0x15   :  { %s462_s13 = scalar_lea.hbm %s629_s0, 128 }
  0x16   :  { %p463_p8 = scmp.ne.s32.totalorder %s629_s0, %s462_s13  ;;  %p466_p9 = scmp.lt.u32.totalorder %s462_s13, %s629_s0 }
  0x18   :  { %p468_p10 = pnand %p466_p9, %p463_p8 }
  0x1a   :  { %471 = shalt.err (!%p468_p10)
}
  0x1b   :  { %s472_s1 = scalar_lea.vmem %s20_s8, 128  ;;  %p477_p12 = scmp.lt.s32.totalorder %s20_s8, %s20_s8 }
  0x1c   :  { %p473_p11 = scmp.ne.s32.totalorder %s20_s8, %s472_s1  ;;  %p478_p13 = scmp.lt.s32.totalorder %s472_s1, %s472_s1 }
  0x1e   :  { %p479_p0 = por %p478_p13, %p477_p12 }
  0x20   :  { %p480_p1 = pnand %p479_p0, %p473_p11 }
  0x22   :  { %483 = shalt.err (!%p480_p1)
}
  0x23   :  { %22 = dma.hbm_to_vmem [thread:$0]  %s629_s0, 128, %s20_s8, [#allocation3]  }
  0x24   :  { %s484_s22 = scalar_lea.hbm %s632_s3, 2048 }
  0x25   :  { %p485_p2 = scmp.ne.s32.totalorder %s632_s3, %s484_s22  ;;  %p488_p3 = scmp.lt.u32.totalorder %s484_s22, %s632_s3 }
  0x27   :  { %p490_p4 = pnand %p488_p3, %p485_p2 }
  0x29   :  { %493 = shalt.err (!%p490_p4)
}
  0x2a   :  { %s494_s27 = scalar_lea.vmem %s43_s10, 2048  ;;  %p499_p6 = scmp.lt.s32.totalorder %s43_s10, %s43_s10 }
  0x2b   :  { %p495_p5 = scmp.ne.s32.totalorder %s43_s10, %s494_s27  ;;  %p500_p7 = scmp.lt.s32.totalorder %s494_s27, %s494_s27 }
  0x2d   :  { %p501_p8 = por %p500_p7, %p499_p6 }
  0x2f   :  { %p502_p9 = pnand %p501_p8, %p495_p5 }
  0x31   :  { %505 = shalt.err (!%p502_p9)
}
  0x32   :  { %s539_s0 = smov 128   ;;  %s540_s28 = smov 8  }
  0x33   :  { %48 = dma.hbm_to_vmem [thread:$0]  %s632_s3, 2048, %s43_s10, [#allocation6], %s539_s0, %s539_s0, %s540_s28  }
  0x34   :  { %528 = dma.done.wait [#allocation3], 128  }
  0x35   :  { %529 = vsyncadd [#allocation3], 4294967168 }
  0x36   :  { %530 = dma.done.wait [#allocation6], 3072  }
  0x37   :  { %531 = vsyncadd [#allocation6], 4294964224  ;;  %v541_v0 = vmov 0.0   ;;  %vm542_vm0 = vmmov 0   ;;  %v408_v1 = vld [vmem:[#allocation5] sm:$0xff]   ;;  %v409_v2 = vld [vmem:[#allocation5 + $0x8] sm:$0xff]   ;;  %v194_v36 = vlaneseq }
  0x38   :  { %377 = vmatprep.subr.bf16.mxu0 %v541_v0  ;;  %393 = vmatprep.mubr.msk.bf16.mxu0 %vm542_vm0, %v541_v0  ;;  %v410_v3 = vld [vmem:[#allocation5 + $0x10] sm:$0xff]   ;;  %v416_v4 = vld [vmem:[#allocation7 + $0x4] ss:$8 sps:$4 sm:$0xff]   ;;  %v418_v5 = vld [vmem:[#allocation7] ss:$8 sps:$4 sm:$0xff]   ;;  %v543_v27 = vmov 0  }
  0x39   :  { %378 = vmatpush3.bf16.msra.mxu0 %v408_v1  ;;  %v411_v6 = vld [vmem:[#allocation5 + $0x18] sm:$0xff]   ;;  %284 = vmatprep.subr.bf16.mxu1 %v416_v4  ;;  %v422_v9 = vld [vmem:[#allocation7 + $0x24] ss:$8 sps:$4 sm:$0xff]   ;;  %v424_v11 = vld [vmem:[#allocation7 + $0x20] ss:$8 sps:$4 sm:$0xff]   ;;  %v195_v37 = vshrl.u32 %v194_v36, 7 }
  0x3a   :  { %379 = vmatprep.subr.bf16.mxu0 %v541_v0  ;;  %v419_v7 = vld [vmem:[#allocation7 + $0x14] ss:$8 sps:$4 sm:$0xff]   ;;  %285 = vmatpush1.bf16.msra.mxu1 %v418_v5  ;;  %v421_v8 = vld [vmem:[#allocation7 + $0x10] ss:$8 sps:$4 sm:$0xff]   ;;  %v412_v10 = vld [vmem:[#allocation5 + $0x20] sm:$0xff]   ;;  %s544_s9 = smov [#allocation8]  }
  0x3b   :  { %286 = vmatprep.subr.bf16.mxu1 %v419_v7  ;;  %v425_v12 = vld [vmem:[#allocation7 + $0x34] ss:$8 sps:$4 sm:$0xff]   ;;  %v413_v13 = vld [vmem:[#allocation5 + $0x28] sm:$0xff]   ;;  %v427_v14 = vld [vmem:[#allocation7 + $0x30] ss:$8 sps:$4 sm:$0xff]   ;;  %316 = vmatprep.mubr.bf16.mxu1 %v543_v27  ;;  %v196_v38 = vsub.s32 0, %v195_v37 }
  0x3c   :  { %v428_v15 = vld [vmem:[#allocation7 + $0x44] ss:$8 sps:$4 sm:$0xff]   ;;  %v414_v16 = vld [vmem:[#allocation5 + $0x30] sm:$0xff]   ;;  %v430_v17 = vld [vmem:[#allocation7 + $0x40] ss:$8 sps:$4 sm:$0xff]   ;;  %v200_v40 = vsub.s32 1, %v195_v37 }
  0x3d   :  { %380 = vmatpush3.bf16.msra.mxu0 %v409_v2  ;;  %v431_v18 = vld [vmem:[#allocation7 + $0x54] ss:$8 sps:$4 sm:$0xff]   ;;  %v433_v21 = vld [vmem:[#allocation7 + $0x50] ss:$8 sps:$4 sm:$0xff]   ;;  %v434_v23 = vld [vmem:[#allocation7 + $0x64] ss:$8 sps:$4 sm:$0xff]  }
  0x3e   :  { %381 = vmatprep.subr.bf16.mxu0 %v541_v0  ;;  %287 = vmatpush1.bf16.msra.mxu1 %v421_v8  ;;  %v415_v19 = vld [vmem:[#allocation5 + $0x38] sm:$0xff]   ;;  %v436_v24 = vld [vmem:[#allocation7 + $0x60] ss:$8 sps:$4 sm:$0xff]  }
  0x3f   :  { %288 = vmatprep.subr.bf16.mxu1 %v422_v9  ;;  %v61_v20 = vld [vmem:[#allocation2] sm:$0xff] }
  0x40   :  { %v62_v22 = vpack.c.bf16 %v61_v20, %v61_v20  ;;  %v437_v25 = vld [vmem:[#allocation7 + $0x74] ss:$8 sps:$4 sm:$0xff]   ;;  %v439_v26 = vld [vmem:[#allocation7 + $0x70] ss:$8 sps:$4 sm:$0xff]  }
  0x41   :  { %382 = vmatpush3.bf16.msra.mxu0 %v410_v3  ;;  %v343_v28 = vld [vmem:[%s631_s2] ss:$0 sm:$0xff]  ;;  %s333_s2 = sshll.u32 %s544_s9, 4  ;;  %s334_s2 = int_to_ptr.vmem [resolvable:$true] %s333_s2 }
  0x42   :  { %383 = vmatprep.subr.bf16.mxu0 %v541_v0  ;;  %289 = vmatpush1.bf16.msra.mxu1 %v424_v11  ;;  %v192_v39 = vld [vmem:[%s633_s4] sm:$0x3]  ;;  %s506_s10 = scalar_lea.vmem %s334_s2, 256  ;;  %p511_p11 = scmp.lt.s32.totalorder %s334_s2, %s334_s2 }
  0x43   :  { %290 = vmatprep.subr.bf16.mxu1 %v425_v12  ;;  %v197_v41 = vrot.slane %v192_v39, %v196_v38  ;;  %v201_v42 = vrot.slane %v192_v39, %v200_v40  ;;  %p507_p10 = scmp.ne.s32.totalorder %s334_s2, %s506_s10  ;;  %p512_p12 = scmp.lt.s32.totalorder %s506_s10, %s506_s10 }
  0x45   :  { %384 = vmatpush3.bf16.msra.mxu0 %v411_v6  ;;  %p513_p13 = por %p512_p12, %p511_p11 }
  0x46   :  { %385 = vmatprep.subr.bf16.mxu0 %v541_v0  ;;  %291 = vmatpush1.bf16.msra.mxu1 %v427_v14 }
  0x47   :  { %292 = vmatprep.subr.bf16.mxu1 %v428_v15  ;;  %p514_p0 = pnand %p513_p13, %p507_p10 }
  0x49   :  { %386 = vmatpush3.bf16.msra.mxu0 %v412_v10 }
  0x4a   :  { %387 = vmatprep.subr.bf16.mxu0 %v541_v0  ;;  %293 = vmatpush1.bf16.msra.mxu1 %v430_v17 }
  0x4b   :  { %294 = vmatprep.subr.bf16.mxu1 %v431_v18 }
  0x4d   :  { %388 = vmatpush3.bf16.msra.mxu0 %v413_v13 }
  0x4e   :  { %389 = vmatprep.subr.bf16.mxu0 %v541_v0  ;;  %295 = vmatpush1.bf16.msra.mxu1 %v433_v21 }
  0x4f   :  { %296 = vmatprep.subr.bf16.mxu1 %v434_v23 }
  0x51   :  { %390 = vmatpush3.bf16.msra.mxu0 %v414_v16 }
  0x52   :  { %391 = vmatprep.subr.bf16.mxu0 %v541_v0  ;;  %297 = vmatpush1.bf16.msra.mxu1 %v436_v24 }
  0x53   :  { %298 = vmatprep.subr.bf16.mxu1 %v437_v25 }
  0x55   :  { %392 = vmatpush3.bf16.msra.mxu0 %v415_v19 }
  0x56   :  { %299 = vmatpush1.bf16.msra.mxu1 %v439_v26 }
  0x58   :  { %394 = vmatmul.mubr.bf16.vlgmr.msra.gmra.mrb[0].mxu0 %v62_v22 }
 0x12b   :  { %v168_v29 = vpop.f32.mrb[0].mxu0 }
 0x12c   :  { %v169_v30 = vadd.f32 %v343_v28, %v168_v29  ;;  %v395_v31 = vpop.f32.mrb[1].mxu0 }
 0x12d   :  { %v171_v32 = vpop.f32.mrb[2].mxu0 }
 0x12e   :  { %v174_v33 = vmax.f32 %v169_v30, 0.0  ;;  %v396_v34 = vpop.f32.mrb[3].mxu0 }
 0x130   :  { %v175_v35 = vpack.c.bf16 %v174_v33, %v174_v33 }
 0x132   :  { %317 = vmatmul.mubr.bf16.vlgmr.msra.gmra.mrb[0].mxu1 %v175_v35 }
 0x205   :  { %v318_v43 = vpop.f32.mrb[0].mxu1 }
 0x206   :  { %v319_v44 = vadd.f32 %v318_v43, %v197_v41  ;;  %v320_v45 = vpop.f32.mrb[1].mxu1 }
 0x207   :  { %v321_v46 = vadd.f32 %v320_v45, %v201_v42  ;;  %v322_v47 = vpop.f32.mrb[2].mxu1 }
 0x208   :  { %325 = vst [vmem:[#allocation8] sm:$0xff] %v319_v44  ;;  %v323_v48 = vpop.f32.mrb[3].mxu1 }
 0x209   :  { %326 = vst [vmem:[#allocation8 + $0x8] sm:$0xff] %v321_v46 }
 0x20a   :  { %517 = shalt.err (!%p514_p0)
}
 0x20b   :  { %s518_s12 = scalar_lea.hbm %s634_s5, 256 }
 0x20c   :  { %p519_p1 = scmp.ne.s32.totalorder %s634_s5, %s518_s12  ;;  %p522_p2 = scmp.lt.u32.totalorder %s518_s12, %s634_s5 }
 0x20e   :  { %p524_p3 = pnand %p522_p2, %p519_p1 }
 0x210   :  { %527 = shalt.err (!%p524_p3)
}
 0x211   :  { %336 = dma.vmem_to_hbm [thread:$0]  %s334_s2, 256, %s634_s5, [#allocation4]  }
 0x212   :  { %532 = dma.done.wait [#allocation4], 256  }
 0x213   :  { %533 = vsyncadd [#allocation4], 4294967040 }
 0x214   :  { %340 = vsyncpa [#allocation3], 1 }
 0x215   :  { %341 = vsyncpa [#allocation6], 1 }
 0x216   :  { %342 = vsyncpa [#allocation4], 1 }

</bundles_post_ra>
